<compile_context>
chip_gen: v7x
topology: tpu7x:2x2x1
jax: 0.10.0
libtpu: 0.0.40
codegen_flags: <defaults>
</compile_context>

<pallas_src>
import jax
import jax.numpy as jnp
from jax.experimental import pallas as pl
from jax.experimental.pallas import tpu as pltpu

STATE_DIM = 3
ACTION_DIM = 1
H1 = 256
H2 = 128
H3 = 64
H3_PAD = 128   # fc3 output padded to a full lane tile
OUT_PAD = 128  # fc4 output padded to a full lane tile (lane-dense store)


def actor_kernel(state_ref, w1_ref, w2_ref, w3_ref, w4_ref, bias_ref, out_ref):
    s = state_ref[...]            # (tb, 3)  f32
    w1 = w1_ref[...]              # (3, 256) f32

    # Static prefix slices of the packed bias array (all lane-aligned at 0,
    # zero beyond each layer's true width).
    b1 = bias_ref[0:1, :]             # (1, 256)
    b2 = bias_ref[1:2, 0:H2]          # (1, 128)
    b3 = bias_ref[2:3, 0:H3_PAD]      # (1, 128), zero beyond H3
    b4 = bias_ref[3:4, 0:OUT_PAD]     # (1, 128), zero beyond ACTION_DIM

    # fc1 on the VPU: K=3 contraction as three rank-1 multiply-adds.  Avoids a
    # padded-K MXU matmul and one MXU push/pop on the critical path.
    acc = b1
    for d in range(STATE_DIM):
        acc = acc + s[:, d:d + 1] * w1[d:d + 1, :]
    h1 = jnp.maximum(acc, 0.0)                                     # (tb, 256)

    cdt = w2_ref.dtype  # compute dtype of the MXU path (f32 or bf16)

    # fc2 / fc3 / fc4 on the MXU, f32 accumulation.
    h2 = jnp.maximum(
        jnp.dot(h1.astype(cdt), w2_ref[...],
                preferred_element_type=jnp.float32) + b2, 0.0)     # (tb, 128)
    h3 = jnp.maximum(
        jnp.dot(h2.astype(cdt), w3_ref[...],
                preferred_element_type=jnp.float32) + b3, 0.0)     # (tb, 128)
    z = jnp.dot(h3.astype(cdt), w4_ref[...],
                preferred_element_type=jnp.float32) + b4           # (tb, 128)

    # out = tanh(fc4(out)) * 2.0 ; padded lanes hold tanh(0)*2 = 0.
    out_ref[...] = jnp.tanh(z) * 2.0


def _linear_init(key, in_dim, out_dim):
    """torch.nn.Linear default init: U(-1/sqrt(fan_in), +1/sqrt(fan_in))."""
    kw, kb = jax.random.split(key)
    bound = 1.0 / jnp.sqrt(jnp.float32(in_dim))
    w = jax.random.uniform(kw, (out_dim, in_dim), jnp.float32, -bound, bound)
    b = jax.random.uniform(kb, (out_dim,), jnp.float32, -bound, bound)
    return w, b


def make_params(key, compute_dtype=jnp.float32):
    """compute_dtype: dtype used for the fc2/fc3/fc4 MXU path (f32 or bf16)."""
    keys = jax.random.split(key, 4)
    w1, b1 = _linear_init(keys[0], STATE_DIM, H1)   # fc1
    w2, b2 = _linear_init(keys[1], H1, H2)          # fc2
    w3, b3 = _linear_init(keys[2], H2, H3)          # fc3
    w4, b4 = _linear_init(keys[3], H3, ACTION_DIM)  # fc4

    # --- one-time kernel-layout preprocessing (hoisted out of the forward) ---
    w1t = jnp.asarray(w1.T)                                        # (3, 256) f32
    w2t = jnp.asarray(w2.T).astype(compute_dtype)                  # (256, 128)
    # fc3 output padded to 128 lanes; fc4 padded on both K (rows) and N (cols).
    w3t_pad = jnp.zeros((H2, H3_PAD), compute_dtype
                        ).at[:, :H3].set(w3.T.astype(compute_dtype))
    w4t_pad = jnp.zeros((H3_PAD, OUT_PAD), compute_dtype
                        ).at[:H3, :ACTION_DIM].set(w4.T.astype(compute_dtype))
    # All biases packed into one f32 operand (rows zero-padded to 256 lanes).
    bias_pack = jnp.zeros((4, H1), jnp.float32)
    bias_pack = bias_pack.at[0, :H1].set(b1)
    bias_pack = bias_pack.at[1, :H2].set(b2)
    bias_pack = bias_pack.at[2, :H3].set(b3)
    bias_pack = bias_pack.at[3, :ACTION_DIM].set(b4)

    return dict(
        # original torch-layout params (used only by the pure-JAX reference)
        w1=w1, b1=b1, w2=w2, b2=b2, w3=w3, b3=b3, w4=w4, b4=b4,
        # kernel-layout params
        w1t=w1t, w2t=w2t, w3t_pad=w3t_pad, w4t_pad=w4t_pad, bias_pack=bias_pack,
    )


def _round_up(x, m):
    return ((x + m - 1) // m) * m


def actor_forward(state, params, *, tile_b=512):
    B = state.shape[0]

    # Fixed working-set tiling: pad the batch instead of growing the block.
    if B <= tile_b:
        b_pad = _round_up(max(B, 1), 8)   # sublane alignment for small batches
        tb = b_pad
    else:
        b_pad = _round_up(B, tile_b)
        tb = tile_b
    if b_pad != B:
        state = jnp.pad(state, ((0, b_pad - B), (0, 0)))
    grid = (b_pad // tb,)

    out_padded = pl.pallas_call(
        actor_kernel,
        out_shape=jax.ShapeDtypeStruct((b_pad, OUT_PAD), jnp.float32),
        grid=grid,
        in_specs=[
            pl.BlockSpec((tb, STATE_DIM), lambda i: (i, 0)),          # state
            pl.BlockSpec((STATE_DIM, H1), lambda i: (0, 0)),          # w1t (f32)
            pl.BlockSpec((H1, H2), lambda i: (0, 0)),                 # w2t
            pl.BlockSpec((H2, H3_PAD), lambda i: (0, 0)),             # w3t (padded)
            pl.BlockSpec((H3_PAD, OUT_PAD), lambda i: (0, 0)),        # w4t (padded)
            pl.BlockSpec((4, H1), lambda i: (0, 0)),                  # packed biases
        ],
        out_specs=pl.BlockSpec((tb, OUT_PAD), lambda i: (i, 0)),
        compiler_params=pltpu.CompilerParams(
            dimension_semantics=("parallel",),
            vmem_limit_bytes=16 << 20,
        ),
    )(state, params["w1t"], params["w2t"], params["w3t_pad"],
      params["w4t_pad"], params["bias_pack"])

    # Drop zero-padded rows/lanes; callers see the torch shape (B, action_dim).
    # (Cheap XLA slice; fuses into its consumer.)
    return out_padded[:B, :ACTION_DIM]


def actor_reference(state, params):
    """Pure-JAX reference mirroring the PyTorch ActorNetwork.forward exactly."""
    relu = lambda x: jnp.maximum(x, 0.0)
    out = relu(state @ params["w1"].T + params["b1"])
    out = relu(out @ params["w2"].T + params["b2"])
    out = relu(out @ params["w3"].T + params["b3"])
    out = jnp.tanh(out @ params["w4"].T + params["b4"]) * 2.0
    return out


if __name__ == "__main__":
    key = jax.random.PRNGKey(0)
    k_params, k_state, k_big = jax.random.split(key, 3)

    # --- small inference-style batch, f32 path (tight tolerance) ---
    B = 8
    state = jax.random.normal(k_state, (B, STATE_DIM), jnp.float32)
    params_f32 = make_params(k_params, compute_dtype=jnp.float32)
    out = jax.block_until_ready(actor_forward(state, params_f32))
    ref = actor_reference(state, params_f32)
    assert out.shape == (B, ACTION_DIM), out.shape
    assert jnp.allclose(out, ref, atol=1e-4, rtol=1e-4), (out, ref)

    # --- bf16 MXU path (v6e/v7x-friendly), looser tolerance ---
    params_bf16 = make_params(k_params, compute_dtype=jnp.bfloat16)
    out_bf16 = jax.block_until_ready(actor_forward(state, params_bf16))
    assert out_bf16.shape == (B, ACTION_DIM), out_bf16.shape
    assert jnp.allclose(out_bf16, ref, atol=5e-2, rtol=5e-2), (out_bf16, ref)

    # --- ragged batch: exercises zero-pad + multi-step grid, fixed block size ---
    B2 = 20
    state2 = jax.random.normal(k_big, (B2, STATE_DIM), jnp.float32)
    out2 = jax.block_until_ready(actor_forward(state2, params_f32, tile_b=16))
    ref2 = actor_reference(state2, params_f32)
    assert out2.shape == (B2, ACTION_DIM), out2.shape
    assert jnp.allclose(out2, ref2, atol=1e-4, rtol=1e-4), (out2, ref2)

    # TODO(synk): select_action's exploration-noise add (stateful host-side OU
    # noise object) + clamp(-2, 2) is left outside the kernel; for the tiny-B
    # action-selection path end-to-end latency is dispatch-dominated and the
    # noise source lives on the host anyway.
    print("KERNEL_OK")
</pallas_src>

<mosaic_0001>
module attributes {stable_mosaic.version = 11 : i64} {
  func.func @actor_kernel(%arg0: i32, %arg1: memref<8x3xf32, #tpu.memory_space<vmem>>, %arg2: memref<3x256xf32, #tpu.memory_space<vmem>>, %arg3: memref<256x128xf32, #tpu.memory_space<vmem>>, %arg4: memref<128x128xf32, #tpu.memory_space<vmem>>, %arg5: memref<128x128xf32, #tpu.memory_space<vmem>>, %arg6: memref<4x256xf32, #tpu.memory_space<vmem>>, %arg7: memref<8x128xf32, #tpu.memory_space<vmem>>) attributes {dimension_semantics = [#tpu.dimension_semantics<parallel>], iteration_bounds = array<i64: 1>, scalar_prefetch = 0 : i64, scratch_operands = 0 : i64, tpu.core_type = #tpu.core_type<tc>, window_params = [{transform_indices = @transform_0, window_bounds = array<i64: 8, 3>}, {pipeline_mode = #tpu.pipeline_mode<synchronous>, transform_indices = @transform_1, window_bounds = array<i64: 3, 256>}, {pipeline_mode = #tpu.pipeline_mode<synchronous>, transform_indices = @transform_2, window_bounds = array<i64: 256, 128>}, {pipeline_mode = #tpu.pipeline_mode<synchronous>, transform_indices = @transform_3, window_bounds = array<i64: 128, 128>}, {pipeline_mode = #tpu.pipeline_mode<synchronous>, transform_indices = @transform_4, window_bounds = array<i64: 128, 128>}, {pipeline_mode = #tpu.pipeline_mode<synchronous>, transform_indices = @transform_5, window_bounds = array<i64: 4, 256>}, {transform_indices = @transform_6, window_bounds = array<i64: 8, 128>}]} {
    %c0 = arith.constant 0 : index
    %c0_0 = arith.constant 0 : index
    %0 = vector.load %arg1[%c0, %c0_0] : memref<8x3xf32, #tpu.memory_space<vmem>>, vector<8x3xf32>
    %c0_1 = arith.constant 0 : index
    %c0_2 = arith.constant 0 : index
    %1 = vector.load %arg2[%c0_1, %c0_2] : memref<3x256xf32, #tpu.memory_space<vmem>>, vector<3x256xf32>
    %c0_3 = arith.constant 0 : index
    %c0_4 = arith.constant 0 : index
    %2 = vector.load %arg6[%c0_3, %c0_4] : memref<4x256xf32, #tpu.memory_space<vmem>>, vector<1x256xf32>
    %c1 = arith.constant 1 : index
    %c0_5 = arith.constant 0 : index
    %3 = vector.load %arg6[%c1, %c0_5] : memref<4x256xf32, #tpu.memory_space<vmem>>, vector<1x128xf32>
    %c2 = arith.constant 2 : index
    %c0_6 = arith.constant 0 : index
    %4 = vector.load %arg6[%c2, %c0_6] : memref<4x256xf32, #tpu.memory_space<vmem>>, vector<1x128xf32>
    %c3 = arith.constant 3 : index
    %c0_7 = arith.constant 0 : index
    %5 = vector.load %arg6[%c3, %c0_7] : memref<4x256xf32, #tpu.memory_space<vmem>>, vector<1x128xf32>
    %6 = vector.extract_strided_slice %0 {offsets = [0, 0], sizes = [8, 1], strides = [1, 1]} : vector<8x3xf32> to vector<8x1xf32>
    %7 = vector.extract_strided_slice %1 {offsets = [0, 0], sizes = [1, 256], strides = [1, 1]} : vector<3x256xf32> to vector<1x256xf32>
    %8 = vector.broadcast %6 : vector<8x1xf32> to vector<8x256xf32>
    %9 = vector.broadcast %7 : vector<1x256xf32> to vector<8x256xf32>
    %10 = arith.mulf %8, %9 : vector<8x256xf32>
    %11 = vector.broadcast %2 : vector<1x256xf32> to vector<8x256xf32>
    %12 = arith.addf %11, %10 : vector<8x256xf32>
    %13 = vector.extract_strided_slice %0 {offsets = [0, 1], sizes = [8, 1], strides = [1, 1]} : vector<8x3xf32> to vector<8x1xf32>
    %14 = vector.extract_strided_slice %1 {offsets = [1, 0], sizes = [1, 256], strides = [1, 1]} : vector<3x256xf32> to vector<1x256xf32>
    %15 = vector.broadcast %13 : vector<8x1xf32> to vector<8x256xf32>
    %16 = vector.broadcast %14 : vector<1x256xf32> to vector<8x256xf32>
    %17 = arith.mulf %15, %16 : vector<8x256xf32>
    %18 = arith.addf %12, %17 : vector<8x256xf32>
    %19 = vector.extract_strided_slice %0 {offsets = [0, 2], sizes = [8, 1], strides = [1, 1]} : vector<8x3xf32> to vector<8x1xf32>
    %20 = vector.extract_strided_slice %1 {offsets = [2, 0], sizes = [1, 256], strides = [1, 1]} : vector<3x256xf32> to vector<1x256xf32>
    %21 = vector.broadcast %19 : vector<8x1xf32> to vector<8x256xf32>
    %22 = vector.broadcast %20 : vector<1x256xf32> to vector<8x256xf32>
    %23 = arith.mulf %21, %22 : vector<8x256xf32>
    %24 = arith.addf %18, %23 : vector<8x256xf32>
    %cst = arith.constant 0.000000e+00 : f32
    %25 = vector.broadcast %cst : f32 to vector<8x256xf32>
    %26 = arith.maximumf %24, %25 : vector<8x256xf32>
    %c0_8 = arith.constant 0 : index
    %c0_9 = arith.constant 0 : index
    %27 = vector.load %arg3[%c0_8, %c0_9] : memref<256x128xf32, #tpu.memory_space<vmem>>, vector<256x128xf32>
    %cst_10 = arith.constant dense<0.000000e+00> : vector<8x128xf32>
    %28 = tpu.matmul %26, %27, %cst_10 {dimension_numbers = #tpu.dot_dimension_numbers<[1], [0], [0], [1], [0, 0, 1, 1], [], []>} : vector<8x256xf32>, vector<256x128xf32>, vector<8x128xf32> -> vector<8x128xf32>
    %29 = vector.broadcast %3 : vector<1x128xf32> to vector<8x128xf32>
    %30 = arith.addf %28, %29 : vector<8x128xf32>
    %cst_11 = arith.constant 0.000000e+00 : f32
    %31 = vector.broadcast %cst_11 : f32 to vector<8x128xf32>
    %32 = arith.maximumf %30, %31 : vector<8x128xf32>
    %c0_12 = arith.constant 0 : index
    %c0_13 = arith.constant 0 : index
    %33 = vector.load %arg4[%c0_12, %c0_13] : memref<128x128xf32, #tpu.memory_space<vmem>>, vector<128x128xf32>
    %cst_14 = arith.constant dense<0.000000e+00> : vector<8x128xf32>
    %34 = tpu.matmul %32, %33, %cst_14 {dimension_numbers = #tpu.dot_dimension_numbers<[1], [0], [0], [1], [0, 0, 1, 1], [], []>} : vector<8x128xf32>, vector<128x128xf32>, vector<8x128xf32> -> vector<8x128xf32>
    %35 = vector.broadcast %4 : vector<1x128xf32> to vector<8x128xf32>
    %36 = arith.addf %34, %35 : vector<8x128xf32>
    %cst_15 = arith.constant 0.000000e+00 : f32
    %37 = vector.broadcast %cst_15 : f32 to vector<8x128xf32>
    %38 = arith.maximumf %36, %37 : vector<8x128xf32>
    %c0_16 = arith.constant 0 : index
    %c0_17 = arith.constant 0 : index
    %39 = vector.load %arg5[%c0_16, %c0_17] : memref<128x128xf32, #tpu.memory_space<vmem>>, vector<128x128xf32>
    %cst_18 = arith.constant dense<0.000000e+00> : vector<8x128xf32>
    %40 = tpu.matmul %38, %39, %cst_18 {dimension_numbers = #tpu.dot_dimension_numbers<[1], [0], [0], [1], [0, 0, 1, 1], [], []>} : vector<8x128xf32>, vector<128x128xf32>, vector<8x128xf32> -> vector<8x128xf32>
    %41 = vector.broadcast %5 : vector<1x128xf32> to vector<8x128xf32>
    %42 = arith.addf %40, %41 : vector<8x128xf32>
    %43 = math.tanh %42 : vector<8x128xf32>
    %cst_19 = arith.constant 2.000000e+00 : f32
    %44 = vector.broadcast %cst_19 : f32 to vector<8x128xf32>
    %45 = arith.mulf %43, %44 : vector<8x128xf32>
    %c0_20 = arith.constant 0 : index
    %c0_21 = arith.constant 0 : index
    %46 = vector.load %arg7[%c0_20, %c0_21] : memref<8x128xf32, #tpu.memory_space<vmem>>, vector<8x128xf32>
    tpu.vector_store %arg7[%c0_20, %c0_21], %45 {strides = array<i32>} : memref<8x128xf32, #tpu.memory_space<vmem>>, vector<8x128xf32>,
    return
  }
  func.func @transform_0(%arg0: i32) -> (i32, i32) {
    %c0_i32 = arith.constant 0 : i32
    %c0_i32_0 = arith.constant 0 : i32
    return %arg0, %c0_i32 : i32, i32
  }
  func.func @transform_1(%arg0: i32) -> (i32, i32) {
    %c0_i32 = arith.constant 0 : i32
    %c0_i32_0 = arith.constant 0 : i32
    %c0_i32_1 = arith.constant 0 : i32
    return %c0_i32, %c0_i32_0 : i32, i32
  }
  func.func @transform_2(%arg0: i32) -> (i32, i32) {
    %c0_i32 = arith.constant 0 : i32
    %c0_i32_0 = arith.constant 0 : i32
    %c0_i32_1 = arith.constant 0 : i32
    return %c0_i32, %c0_i32_0 : i32, i32
  }
  func.func @transform_3(%arg0: i32) -> (i32, i32) {
    %c0_i32 = arith.constant 0 : i32
    %c0_i32_0 = arith.constant 0 : i32
    %c0_i32_1 = arith.constant 0 : i32
    return %c0_i32, %c0_i32_0 : i32, i32
  }
  func.func @transform_4(%arg0: i32) -> (i32, i32) {
    %c0_i32 = arith.constant 0 : i32
    %c0_i32_0 = arith.constant 0 : i32
    %c0_i32_1 = arith.constant 0 : i32
    return %c0_i32, %c0_i32_0 : i32, i32
  }
  func.func @transform_5(%arg0: i32) -> (i32, i32) {
    %c0_i32 = arith.constant 0 : i32
    %c0_i32_0 = arith.constant 0 : i32
    %c0_i32_1 = arith.constant 0 : i32
    return %c0_i32, %c0_i32_0 : i32, i32
  }
  func.func @transform_6(%arg0: i32) -> (i32, i32) {
    %c0_i32 = arith.constant 0 : i32
    %c0_i32_0 = arith.constant 0 : i32
    return %arg0, %c0_i32 : i32, i32
  }
}

</mosaic_0001>

<bundles_post_ra>
// kernel: tpu_custom_call.1
= control target key start
LH: loop header
LB: loop body
LE: loop exit
PB: predicated region body
PF: predicated region fallthrough
CT: control target
= control target key end

     0   :  { %11 = vsyncpa [#allocation3], 0  ;;  %s950_s0 = inlined_call_operand.vmem [shape: f32[8,3], index: 0, kind: input, shape index: {}]   ;;  %s951_s1 = inlined_call_operand.vmem [shape: f32[3,256], index: 1, kind: input, shape index: {}]   ;;  %s952_s2 = inlined_call_operand.hbm [shape: f32[256,128], index: 2, kind: input, shape index: {}]   ;;  %s953_s3 = inlined_call_operand.hbm [shape: f32[128,128], index: 3, kind: input, shape index: {}]   ;;  %s954_s4 = inlined_call_operand.hbm [shape: f32[128,128], index: 4, kind: input, shape index: {}]   ;;  %s955_s5 = inlined_call_operand.vmem [shape: f32[4,256], index: 5, kind: input, shape index: {}]   ;;  %s956_s6 = inlined_call_operand.hbm [shape: f32[8,128], index: 6, kind: output, shape index: {}]  }
   0x1   :  { %12 = vsyncpa [#allocation6], 0 }
   0x2   :  { %13 = vsyncpa [#allocation4], 0  ;;  %s805_s21 = smov [#allocation5]   ;;  %s806_s23 = smov [#allocation2]  }
   0x3   :  { %s35_s22 = sshll.u32 %s805_s21, 4  ;;  %s23_s24 = sshll.u32 %s806_s23, 4  ;;  %s36_s22 = int_to_ptr.vmem [resolvable:$true] %s35_s22  ;;  %s852_s24 = int_to_ptr.vmem [resolvable:$true] %s23_s24 }
   0x4   :  { %s711_s27 = scalar_lea.hbm %s953_s3, 2048 }
   0x5   :  { %p712_p0 = scmp.ne.s32.totalorder %s953_s3, %s711_s27  ;;  %p715_p1 = scmp.lt.u32.totalorder %s711_s27, %s953_s3 }
   0x7   :  { %p717_p2 = pnand %p715_p1, %p712_p0 }
   0x9   :  { %720 = shalt.err (!%p717_p2)
}
   0xa   :  { %s721_s8 = scalar_lea.vmem %s36_s22, 2048  ;;  %p726_p4 = scmp.lt.s32.totalorder %s36_s22, %s36_s22 }
   0xb   :  { %p722_p3 = scmp.ne.s32.totalorder %s36_s22, %s721_s8  ;;  %p727_p5 = scmp.lt.s32.totalorder %s721_s8, %s721_s8 }
   0xd   :  { %p728_p6 = por %p727_p5, %p726_p4 }
   0xf   :  { %p729_p7 = pnand %p728_p6, %p722_p3 }
  0x11   :  { %732 = shalt.err (!%p729_p7)
}
  0x12   :  { %s807_s9 = smov 128   ;;  %s808_s10 = smov 8  }
  0x13   :  { %41 = dma.hbm_to_vmem [thread:$0]  %s953_s3, 2048, %s36_s22, [#allocation6], %s807_s9, %s807_s9, %s808_s10  }
  0x14   :  { %s733_s15 = scalar_lea.hbm %s952_s2, 4096 }
  0x15   :  { %p734_p8 = scmp.ne.s32.totalorder %s952_s2, %s733_s15  ;;  %p737_p9 = scmp.lt.u32.totalorder %s733_s15, %s952_s2 }
  0x17   :  { %p739_p10 = pnand %p737_p9, %p734_p8 }
  0x19   :  { %742 = shalt.err (!%p739_p10)
}
  0x1a   :  { %s743_s20 = scalar_lea.vmem %s852_s24, 4096  ;;  %p748_p12 = scmp.lt.s32.totalorder %s852_s24, %s852_s24 }
  0x1b   :  { %p744_p11 = scmp.ne.s32.totalorder %s852_s24, %s743_s20  ;;  %p749_p13 = scmp.lt.s32.totalorder %s743_s20, %s743_s20 }
  0x1d   :  { %p750_p0 = por %p749_p13, %p748_p12 }
  0x1f   :  { %p751_p1 = pnand %p750_p0, %p744_p11 }
  0x21   :  { %754 = shalt.err (!%p751_p1)
}
  0x22   :  { %29 = dma.hbm_to_vmem [thread:$0]  %s952_s2, 4096, %s852_s24, [#allocation3], %s807_s9, %s807_s9, %s808_s10  }
  0x23   :  { %s809_s22 = smov [#allocation7]   ;;  %s755_s27 = scalar_lea.hbm %s954_s4, 2048 }
  0x24   :  { %s47_s23 = sshll.u32 %s809_s22, 4  ;;  %p756_p2 = scmp.ne.s32.totalorder %s954_s4, %s755_s27  ;;  %s48_s23 = int_to_ptr.vmem [resolvable:$true] %s47_s23 }
  0x25   :  { %p759_p3 = scmp.lt.u32.totalorder %s755_s27, %s954_s4 }
  0x27   :  { %p761_p4 = pnand %p759_p3, %p756_p2 }
  0x29   :  { %764 = shalt.err (!%p761_p4)
}
  0x2a   :  { %s765_s8 = scalar_lea.vmem %s48_s23, 2048  ;;  %p770_p6 = scmp.lt.s32.totalorder %s48_s23, %s48_s23 }
  0x2b   :  { %p766_p5 = scmp.ne.s32.totalorder %s48_s23, %s765_s8  ;;  %p771_p7 = scmp.lt.s32.totalorder %s765_s8, %s765_s8 }
  0x2d   :  { %p772_p8 = por %p771_p7, %p770_p6 }
  0x2f   :  { %p773_p9 = pnand %p772_p8, %p766_p5 }
  0x31   :  { %776 = shalt.err (!%p773_p9)
}
  0x32   :  { %53 = dma.hbm_to_vmem [thread:$0]  %s954_s4, 2048, %s48_s23, [#allocation6], %s807_s9, %s807_s9, %s808_s10  }
  0x33   :  { %799 = dma.done.wait [#allocation3], 4096  }
  0x34   :  { %800 = vsyncadd [#allocation3], 4294963200 }
  0x35   :  { %801 = dma.done.wait [#allocation6], 4096  }
  0x36   :  { %802 = vsyncadd [#allocation6], 4294963200  ;;  %v810_v0 = vmov 0   ;;  %v811_v1 = vmov 2   ;;  %v65_v2 = vld [vmem:[%s950_s0] sm:$0xff]  ;;  %v180_v3 = vld [vmem:[#allocation2 + $0x80] sm:$0xff] }
  0x37   :  { %705 = vset.pattern.permute.xlu0 %v810_v0  ;;  %707 = vset.pattern.permute.xlu1 %v811_v1  ;;  %v181_v4 = vld [vmem:[#allocation2 + $0x88] sm:$0xff]  ;;  %v164_v6 = vld [vmem:[#allocation2] sm:$0xff]  ;;  %v182_v8 = vld [vmem:[#allocation2 + $0x90] sm:$0xff]  ;;  %v812_v17 = vmov 1   ;;  %v813_v39 = vmov 0.0|0.0   ;;  %vm814_vm0 = vmmov 0  }
  0x38   :  { %73 = vperm.xlu0 %705, %v65_v2   ;;  %137 = vperm.xlu1 %707, %v65_v2   ;;  %v613_v5 = vpack.c.bf16 %v181_v4, %v180_v3  ;;  %v165_v7 = vld [vmem:[#allocation2 + $0x8] sm:$0xff]  ;;  %v183_v10 = vld [vmem:[#allocation2 + $0x98] sm:$0xff]  ;;  %v166_v11 = vld [vmem:[#allocation2 + $0x10] sm:$0xff]  ;;  %s816_s18 = smov [#allocation8]  }
  0x39   :  { %v615_v9 = vpack.c.bf16 %v165_v7, %v164_v6  ;;  %v167_v12 = vld [vmem:[#allocation2 + $0x18] sm:$0xff]  ;;  %v617_v13 = vpack.c.bf16 %v183_v10, %v182_v8  ;;  %v184_v14 = vld [vmem:[#allocation2 + $0xa0] sm:$0xff]  ;;  %v185_v15 = vld [vmem:[#allocation2 + $0xa8] sm:$0xff]  ;;  %645 = vmatprep.subr.bf16.mxu1 %v813_v39  ;;  %v77_v7 = vlaneseq  ;;  %s461_s19 = sshll.u32 %s816_s18, 4  ;;  %s462_s19 = int_to_ptr.vmem [resolvable:$true] %s461_s19 }
  0x3a   :  { %614 = vmatprep.subr.bf16.mxu0 %v613_v5  ;;  %v619_v16 = vpack.c.bf16 %v167_v12, %v166_v11  ;;  %v621_v18 = vpack.c.bf16 %v185_v15, %v184_v14  ;;  %v168_v19 = vld [vmem:[#allocation2 + $0x20] sm:$0xff]  ;;  %v169_v20 = vld [vmem:[#allocation2 + $0x28] sm:$0xff]  ;;  %v186_v21 = vld [vmem:[#allocation2 + $0xb0] sm:$0xff]  ;;  %s777_s20 = scalar_lea.vmem %s462_s19, 128  ;;  %p782_p11 = scmp.lt.s32.totalorder %s462_s19, %s462_s19 }
  0x3b   :  { %616 = vmatpush3.bf16.msra.mxu0 %v615_v9  ;;  %v187_v22 = vld [vmem:[#allocation2 + $0xb8] sm:$0xff]  ;;  %v623_v23 = vpack.c.bf16 %v169_v20, %v168_v19  ;;  %v170_v25 = vld [vmem:[#allocation2 + $0x30] sm:$0xff]  ;;  %v188_v27 = vld [vmem:[#allocation2 + $0xc0] sm:$0xff]  ;;  %v78_v8 = vshrl.u32 %v77_v7, 7  ;;  %p778_p10 = scmp.ne.s32.totalorder %s462_s19, %s777_s20  ;;  %p783_p12 = scmp.lt.s32.totalorder %s777_s20, %s777_s20 }
  0x3c   :  { %706 = vset.pattern.permute.xlu0 %v812_v17  ;;  %618 = vmatprep.subr.bf16.mxu0 %v617_v13  ;;  %v625_v24 = vpack.c.bf16 %v187_v22, %v186_v21  ;;  %v171_v26 = vld [vmem:[#allocation2 + $0x38] sm:$0xff]  ;;  %v189_v28 = vld [vmem:[#allocation2 + $0xc8] sm:$0xff]  ;;  %v172_v31 = vld [vmem:[#allocation2 + $0x40] sm:$0xff] }
  0x3d   :  { %111 = vperm.xlu0 %706, %v65_v2   ;;  %v627_v29 = vpack.c.bf16 %v171_v26, %v170_v25  ;;  %v629_v30 = vpack.c.bf16 %v189_v28, %v188_v27  ;;  %v173_v32 = vld [vmem:[#allocation2 + $0x48] sm:$0xff]  ;;  %v190_v33 = vld [vmem:[#allocation2 + $0xd0] sm:$0xff]  ;;  %v191_v34 = vld [vmem:[#allocation2 + $0xd8] sm:$0xff]  ;;  %v79_v9 = vsub.s32 0, %v78_v8  ;;  %v83_v10 = vsub.s32 4, %v78_v8  ;;  %p784_p13 = por %p783_p12, %p782_p11 }
  0x3e   :  { %v271_v35 = vld [vmem:[#allocation5] sm:$0xff]  ;;  %v272_v36 = vld [vmem:[#allocation5 + $0x8] sm:$0xff]  ;;  %v273_v37 = vld [vmem:[#allocation5 + $0x10] sm:$0xff]  ;;  %v631_v38 = vpack.c.bf16 %v173_v32, %v172_v31  ;;  %v633_v42 = vpack.c.bf16 %v191_v34, %v190_v33  ;;  %v142_v12 = vsub.s32 2, %v78_v8  ;;  %v146_v13 = vsub.s32 6, %v78_v8 }
  0x3f   :  { %620 = vmatpush3.bf16.msra.mxu0 %v619_v16  ;;  %v646_v40 = vpack.c.bf16 %v272_v36, %v271_v35  ;;  %v274_v41 = vld [vmem:[#allocation5 + $0x18] sm:$0xff]  ;;  %v174_v43 = vld [vmem:[#allocation2 + $0x50] sm:$0xff]  ;;  %v192_v45 = vld [vmem:[#allocation2 + $0xe0] sm:$0xff]  ;;  %v104_v16 = vsub.s32 1, %v78_v8  ;;  %v120_v17 = vsub.s32 5, %v78_v8  ;;  %p785_p0 = pnand %p784_p13, %p778_p10 }
  0x40   :  { %622 = vmatprep.subr.bf16.mxu0 %v621_v18  ;;  %v175_v44 = vld [vmem:[#allocation2 + $0x58] sm:$0xff]  ;;  %v193_v46 = vld [vmem:[#allocation2 + $0xe8] sm:$0xff]  ;;  %v649_v47 = vpack.c.bf16 %v274_v41, %v273_v37  ;;  %v275_v48 = vld [vmem:[#allocation5 + $0x20] sm:$0xff] }
  0x41   :  { %708 = vset.pattern.permute.xlu0 %v811_v1  ;;  %647 = vmatpush3.bf16.msra.mxu1 %v646_v40  ;;  %v276_v49 = vld [vmem:[#allocation5 + $0x28] sm:$0xff]  ;;  %v635_v50 = vpack.c.bf16 %v175_v44, %v174_v43  ;;  %v637_v51 = vpack.c.bf16 %v193_v46, %v192_v45  ;;  %v176_v52 = vld [vmem:[#allocation2 + $0x60] sm:$0xff]  ;;  %v194_v54 = vld [vmem:[#allocation2 + $0xf0] sm:$0xff] }
  0x42   :  { %648 = vmatprep.subr.bf16.mxu1 %v813_v39  ;;  %v177_v53 = vld [vmem:[#allocation2 + $0x68] sm:$0xff]  ;;  %v195_v55 = vld [vmem:[#allocation2 + $0xf8] sm:$0xff]  ;;  %v652_v56 = vpack.c.bf16 %v276_v49, %v275_v48  ;;  %v277_v57 = vld [vmem:[#allocation5 + $0x30] sm:$0xff] }
  0x43   :  { %624 = vmatpush3.bf16.msra.mxu0 %v623_v23  ;;  %v278_v58 = vld [vmem:[#allocation5 + $0x38] sm:$0xff]  ;;  %v639_v59 = vpack.c.bf16 %v177_v53, %v176_v52  ;;  %v641_v60 = vpack.c.bf16 %v195_v55, %v194_v54  ;;  %v178_v61 = vld [vmem:[#allocation2 + $0x70] sm:$0xff]  ;;  %v279_v0 = vld [vmem:[#allocation5 + $0x40] sm:$0xff]  ;;  %v815_v55 = vmov 0.0  }
  0x44   :  { %626 = vmatprep.subr.bf16.mxu0 %v625_v24  ;;  %v179_v62 = vld [vmem:[#allocation2 + $0x78] sm:$0xff]  ;;  %v655_v63 = vpack.c.bf16 %v278_v58, %v277_v57  ;;  %v280_v1 = vld [vmem:[#allocation5 + $0x48] sm:$0xff]  ;;  %v281_v4 = vld [vmem:[#allocation5 + $0x50] sm:$0xff]  ;;  %575 = vmatprep.mubr.msk.f32.mxu1 %vm814_vm0, %v815_v55 }
  0x45   :  { %650 = vmatpush3.bf16.msra.mxu1 %v649_v47  ;;  %v643_v2 = vpack.c.bf16 %v179_v62, %v178_v61  ;;  %v658_v3 = vpack.c.bf16 %v280_v1, %v279_v0  ;;  %v282_v5 = vld [vmem:[#allocation5 + $0x58] sm:$0xff]  ;;  %v66_v11 = vld [vmem:[%s951_s1] sm:$0x77]  ;;  %v283_v49 = vld [vmem:[#allocation5 + $0x60] sm:$0xff] }
  0x46   :  { %651 = vmatprep.subr.bf16.mxu1 %v813_v39  ;;  %v661_v6 = vpack.c.bf16 %v282_v5, %v281_v4  ;;  %v80_v14 = vrot.slane %v66_v11, %v79_v9  ;;  %v84_v15 = vrot.slane %v66_v11, %v83_v10  ;;  %v143_v18 = vrot.slane %v66_v11, %v142_v12  ;;  %v67_v20 = vld [vmem:[%s955_s5] ss:$4 sm:$0x3]  ;;  %v286_v53 = vld [vmem:[#allocation5 + $0x78] sm:$0xff]  ;;  %v363_v57 = vld [vmem:[#allocation7 + $0x8] sm:$0xff] }
  0x47   :  { %628 = vmatpush3.bf16.msra.mxu0 %v627_v29  ;;  %v147_v19 = vrot.slane %v66_v11, %v146_v13  ;;  %v117_v23 = vrot.slane %v66_v11, %v104_v16  ;;  %v121_v24 = vrot.slane %v66_v11, %v120_v17  ;;  %v101_v26 = vrot.slane %v67_v20, %v79_v9  ;;  %v285_v52 = vld [vmem:[#allocation5 + $0x70] sm:$0xff]  ;;  %v366_v62 = vld [vmem:[#allocation7 + $0x20] sm:$0xff]  ;;  %v371_v5 = vld [vmem:[#allocation7 + $0x48] sm:$0xff] }
  0x48   :  { %630 = vmatprep.subr.bf16.mxu0 %v629_v30  ;;  %v90_v21 = vrot.slane %v80_v14, %v79_v9  ;;  %v94_v22 = vrot.slane %v84_v15, %v79_v9  ;;  %v105_v27 = vrot.slane %v67_v20, %v104_v16  ;;  %v153_v28 = vrot.slane %v143_v18, %v142_v12  ;;  %v364_v58 = vld [vmem:[#allocation7 + $0x10] sm:$0xff]  ;;  %v370_v4 = vld [vmem:[#allocation7 + $0x40] sm:$0xff]  ;;  %v373_v8 = vld [vmem:[#allocation7 + $0x58] sm:$0xff] }
  0x49   :  { %653 = vmatpush3.bf16.msra.mxu1 %v652_v56  ;;  %v157_v29 = vrot.slane %v147_v19, %v142_v12  ;;  %v127_v32 = vrot.slane %v117_v23, %v104_v16  ;;  %v131_v33 = vrot.slane %v121_v24, %v104_v16  ;;  %v667_v54 = vpack.c.bf16 %v286_v53, %v285_v52  ;;  %v362_v56 = vld [vmem:[#allocation7] sm:$0xff]  ;;  %v368_v1 = vld [vmem:[#allocation7 + $0x30] sm:$0xff]  ;;  %v375_v11 = vld [vmem:[#allocation7 + $0x68] sm:$0xff] }
  0x4a   :  { %654 = vmatprep.subr.bf16.mxu1 %v813_v39  ;;  %v372_v7 = vld [vmem:[#allocation7 + $0x50] sm:$0xff]  ;;  %v374_v10 = vld [vmem:[#allocation7 + $0x60] sm:$0xff]  ;;  %v377_v20 = vld [vmem:[#allocation7 + $0x78] sm:$0xff] }
  0x4b   :  { %632 = vmatpush3.bf16.msra.mxu0 %v631_v38  ;;  %v685_v9 = vpack.c.bf16 %v373_v8, %v372_v7  ;;  %v688_v12 = vpack.c.bf16 %v375_v11, %v374_v10  ;;  %v471_v14 = vld [vmem:[%s955_s5 + $0x1] ss:$0 sm:$0xff] }
  0x4c   :  { %634 = vmatprep.subr.bf16.mxu0 %v633_v42  ;;  %v376_v19 = vld [vmem:[#allocation7 + $0x70] sm:$0xff] }
  0x4d   :  { %656 = vmatpush3.bf16.msra.mxu1 %v655_v63  ;;  %v367_v63 = vld [vmem:[#allocation7 + $0x28] sm:$0xff] }
  0x4e   :  { %657 = vmatprep.subr.bf16.mxu1 %v813_v39  ;;  %v676_v0 = vpack.c.bf16 %v367_v63, %v366_v62 }
  0x4f   :  { %636 = vmatpush3.bf16.msra.mxu0 %v635_v50  ;;  %v284_v50 = vld [vmem:[#allocation5 + $0x68] sm:$0xff] }
  0x50   :  { %638 = vmatprep.subr.bf16.mxu0 %v637_v51  ;;  %v664_v51 = vpack.c.bf16 %v284_v50, %v283_v49 }
  0x51   :  { %659 = vmatpush3.bf16.msra.mxu1 %v658_v3 }
  0x52   :  { %660 = vmatprep.subr.bf16.mxu1 %v813_v39 }
  0x53   :  { %640 = vmatpush3.bf16.msra.mxu0 %v639_v59  ;;  %v670_v59 = vpack.c.bf16 %v363_v57, %v362_v56 }
  0x54   :  { %642 = vmatprep.subr.bf16.mxu0 %v641_v60  ;;  %v365_v60 = vld [vmem:[#allocation7 + $0x18] sm:$0xff] }
  0x55   :  { %662 = vmatpush3.bf16.msra.mxu1 %v661_v6  ;;  %v673_v61 = vpack.c.bf16 %v365_v60, %v364_v58  ;;  %v682_v6 = vpack.c.bf16 %v371_v5, %v370_v4 }
  0x56   :  { %663 = vmatprep.subr.bf16.mxu1 %v813_v39 }
  0x57   :  { %644 = vmatpush3.bf16.msra.mxu0 %v643_v2  ;;  %v369_v2 = vld [vmem:[#allocation7 + $0x38] sm:$0xff] }
  0x58   :  { %669 = vmatprep.subr.bf16.mxu0 %v813_v39  ;;  %v679_v3 = vpack.c.bf16 %v369_v2, %v368_v1 }
  0x59   :  { %665 = vmatpush3.bf16.msra.mxu1 %v664_v51 }
  0x5a   :  { %666 = vmatprep.subr.bf16.mxu1 %v813_v39 }
  0x5d   :  { %668 = vmatpush3.bf16.msra.mxu1 %v667_v54 }
  0xb7   :  { %v74_v25 = vpop.permute.xlu0 %73  ;;  %v138_v34 = vpop.permute.xlu1 %137 }
  0xb8   :  { %v95_v30 = vmul.f32 %v90_v21, %v74_v25  ;;  %v96_v31 = vmul.f32 %v94_v22, %v74_v25  ;;  %v158_v36 = vmul.f32 %v153_v28, %v138_v34  ;;  %v159_v37 = vmul.f32 %v157_v29, %v138_v34  ;;  %v472_v22 = vld [vmem:[%s955_s5 + $0x2] ss:$0 sm:$0xff] }
  0xb9   :  { %v691_v21 = vpack.c.bf16 %v377_v20, %v376_v19 }
  0xba   :  { %v108_v38 = vadd.f32 %v101_v26, %v95_v30  ;;  %v109_v40 = vadd.f32 %v105_v27, %v96_v31  ;;  %v473_v26 = vld [vmem:[%s955_s5 + $0x3] ss:$0 sm:$0xff] }
  0xbc   :  { %v112_v35 = vpop.permute.xlu0 %111 }
  0xbd   :  { %v132_v41 = vmul.f32 %v127_v32, %v112_v35  ;;  %v133_v42 = vmul.f32 %v131_v33, %v112_v35 }
  0xbf   :  { %v134_v43 = vadd.f32 %v132_v41, %v108_v38  ;;  %v135_v44 = vadd.f32 %v133_v42, %v109_v40 }
  0xc1   :  { %v160_v45 = vadd.f32 %v158_v36, %v134_v43  ;;  %v161_v46 = vadd.f32 %v159_v37, %v135_v44 }
  0xc3   :  { %v162_v47 = vmax.f32 %v160_v45, 0.0  ;;  %v163_v48 = vmax.f32 %v161_v46, 0.0 }
  0xc5   :  { %264 = vmatprep.mubr.f32.mxu0 %v163_v48 }
  0xc6   :  { %265 = vmatmul.mubr.f32.vlgmr.msra.gmra.mrb[0].mxu0 %v162_v47 }
  0xc7   :  { %610 = vmatprep.mubr.msk.f32.mxu0 %vm814_vm0, %v815_v55  ;;  %671 = vmatpush3.bf16.msra.mxu0 %v670_v59 }
  0xc8   :  { %672 = vmatprep.subr.bf16.mxu0 %v813_v39 }
  0xcb   :  { %674 = vmatpush3.bf16.msra.mxu0 %v673_v61 }
  0xcc   :  { %675 = vmatprep.subr.bf16.mxu0 %v813_v39 }
  0xcf   :  { %677 = vmatpush3.bf16.msra.mxu0 %v676_v0 }
  0xd0   :  { %678 = vmatprep.subr.bf16.mxu0 %v813_v39 }
  0xd3   :  { %680 = vmatpush3.bf16.msra.mxu0 %v679_v3 }
  0xd4   :  { %681 = vmatprep.subr.bf16.mxu0 %v813_v39 }
  0xd7   :  { %683 = vmatpush3.bf16.msra.mxu0 %v682_v6 }
  0xd8   :  { %684 = vmatprep.subr.bf16.mxu0 %v813_v39 }
  0xdb   :  { %686 = vmatpush3.bf16.msra.mxu0 %v685_v9 }
  0xdc   :  { %687 = vmatprep.subr.bf16.mxu0 %v813_v39 }
  0xdf   :  { %689 = vmatpush3.bf16.msra.mxu0 %v688_v12 }
  0xe0   :  { %690 = vmatprep.subr.bf16.mxu0 %v813_v39 }
  0xe3   :  { %692 = vmatpush3.bf16.msra.mxu0 %v691_v21 }
 0x199   :  { %v506_v13 = vpop.f32.mrb[0].mxu0 }
 0x19a   :  { %v507_v15 = vpop.f32.mrb[1].mxu0 }
 0x19b   :  { %v508_v16 = vadd.f32 %v507_v15, %v506_v13 }
 0x19d   :  { %v267_v17 = vadd.f32 %v508_v16, %v471_v14 }
 0x19f   :  { %v270_v18 = vmax.f32 %v267_v17, 0.0 }
 0x1a1   :  { %576 = vmatmul.mubr.f32.vlgmr.msra.gmra.mrb[0].mxu1 %v270_v18 }
 0x274   :  { %v357_v23 = vpop.f32.mrb[0].mxu1 }
 0x275   :  { %v358_v39 = vadd.f32 %v472_v22, %v357_v23  ;;  %v577_v24 = vpop.f32.mrb[1].mxu1 }
 0x277   :  { %v361_v25 = vmax.f32 %v358_v39, 0.0 }
 0x279   :  { %611 = vmatmul.mubr.f32.vlgmr.msra.gmra.mrb[2].mxu0 %v361_v25 }
 0x34c   :  { %v448_v27 = vpop.f32.mrb[2].mxu0 }
 0x34d   :  { %v449_v28 = vadd.f32 %v473_v26, %v448_v27  ;;  %v612_v29 = vpop.f32.mrb[3].mxu0 }
 0x34f   :  { %709 = vtanh.f32 %v449_v28 }
 0x359   :  { %v710_v30 = vpop.eup %709 }
 0x35a   :  { %v453_v31 = vmul.f32 2.0, %v710_v30 }
 0x35c   :  { %454 = vst [vmem:[#allocation8] sm:$0xff] %v453_v31 }
 0x35d   :  { %788 = shalt.err (!%p785_p0)
}
 0x35e   :  { %s789_s5 = scalar_lea.hbm %s956_s6, 128 }
 0x35f   :  { %p790_p1 = scmp.ne.s32.totalorder %s956_s6, %s789_s5  ;;  %p793_p2 = scmp.lt.u32.totalorder %s789_s5, %s956_s6 }
 0x361   :  { %p795_p3 = pnand %p793_p2, %p790_p1 }
 0x363   :  { %798 = shalt.err (!%p795_p3)
}
 0x364   :  { %464 = dma.vmem_to_hbm [thread:$0]  %s462_s19, 128, %s956_s6, [#allocation4]  }
 0x365   :  { %803 = dma.done.wait [#allocation4], 128  }
 0x366   :  { %804 = vsyncadd [#allocation4], 4294967168 }
 0x367   :  { %468 = vsyncpa [#allocation3], 1 }
 0x368   :  { %469 = vsyncpa [#allocation6], 1 }
 0x369   :  { %470 = vsyncpa [#allocation4], 1 }

</bundles_post_ra>
